<compile_context>
chip_gen: v7x
topology: tpu7x:2x2x1
jax: 0.10.0
libtpu: 0.0.40
codegen_flags: <defaults>
</compile_context>

<pallas_src>
import jax
import jax.numpy as jnp
from jax.experimental import pallas as pl
from jax.experimental.pallas import tpu as pltpu

BN_EPS = 1e-5
TM = 512  # M tile; K and N are always single full blocks (K<=800, N<=432)


def _round_up(n, m):
    return ((n + m - 1) // m) * m


# ----------------------------------------------------------------------------
# Pallas kernel: single-pass matmul with fused bias + ReLU epilogue.
#   x_ref: (tm, K) bf16, w_ref: (K, N) bf16, b_ref: (1, N) f32, o_ref: (tm, N) f32
# ----------------------------------------------------------------------------
def _fused_matmul_kernel(x_ref, w_ref, b_ref, o_ref):
    acc = jnp.dot(x_ref[...], w_ref[...], preferred_element_type=jnp.float32)
    o_ref[...] = jnp.maximum(acc + b_ref[...], 0.0).astype(o_ref.dtype)


def matmul_bias_relu(x, w, b2d):
    """relu(x @ w + b) via a Pallas TPU kernel.

    x: (M, K) (cast to bf16), w: (K, N) (cast to bf16), b2d: (1, N) f32.
    Returns (M, N) f32.  Only M is tiled; K and N are full blocks.
    """
    x = x.astype(jnp.bfloat16)
    w = w.astype(jnp.bfloat16)
    b2d = b2d.astype(jnp.float32)

    M, K = x.shape
    K2, N = w.shape
    assert K == K2 and b2d.shape == (1, N)

    tm = min(TM, _round_up(M, 8))
    Mp = max(M, tm)
    if Mp != M:  # only tiny matmuls (e.g. the batch-2 linears) hit this
        x = jnp.pad(x, ((0, Mp - M), (0, 0)))

    out = pl.pallas_call(
        _fused_matmul_kernel,
        out_shape=jax.ShapeDtypeStruct((Mp, N), jnp.float32),
        grid=(pl.cdiv(Mp, tm),),
        in_specs=[
            pl.BlockSpec((tm, K), lambda i: (i, 0)),
            pl.BlockSpec((K, N), lambda i: (0, 0)),
            pl.BlockSpec((1, N), lambda i: (0, 0)),
        ],
        out_specs=pl.BlockSpec((tm, N), lambda i: (i, 0)),
        compiler_params=pltpu.CompilerParams(
            dimension_semantics=("parallel",),
            vmem_limit_bytes=32 * 1024 * 1024,
        ),
    )(x, w, b2d)

    return out[:M] if Mp != M else out


# ----------------------------------------------------------------------------
# Glue (all inside jit): NHWC patch extraction, pooling, unpooling.
# ----------------------------------------------------------------------------
def conv_bn_relu(x_nhwc, layer, k, pad):
    """k x k, stride-1 conv (optionally spatially pre-padded) + folded BN + ReLU."""
    xb = x_nhwc.astype(jnp.bfloat16)
    if pad:
        xb = jnp.pad(xb, ((0, 0), (pad, pad), (pad, pad), (0, 0)))
    n, h, w, c = xb.shape
    ho, wo = h - k + 1, w - k + 1
    # Patch feature order: (dh, dw, cin) -- must match weight layout in prepare_params.
    cols = [xb[:, dh:dh + ho, dw:dw + wo, :] for dh in range(k) for dw in range(k)]
    patches = jnp.concatenate(cols, axis=-1).reshape(n * ho * wo, k * k * c)
    out = matmul_bias_relu(patches, layer['wm'], layer['b'])
    cout = layer['wm'].shape[1]
    return out.reshape(n, ho, wo, cout)


def linear_bn_relu(x2d, layer):
    return matmul_bias_relu(x2d, layer['wm'], layer['b'])


def maxpool2x2(x):
    """MaxPool2d(2, 2) in NHWC (PyTorch floor behavior: trailing odd row/col dropped)."""
    n, h, w, c = x.shape
    h2, w2 = (h // 2) * 2, (w // 2) * 2
    x = x[:, :h2, :w2, :]
    return x.reshape(n, h2 // 2, 2, w2 // 2, 2, c).max(axis=(2, 4))


def unpool2x2(x, out_hw):
    """MaxUnpool2d(2, 2) with 'default' indices, NHWC.

    # TODO(synk): default_maxunpool_indices is not provided; we assume the
    # canonical default of placing each value at the top-left of its 2x2 window
    # (bed-of-nails), then zero-padding up to the requested output_size.
    """
    n, h, w, c = x.shape
    up = jnp.zeros((n, h, 2, w, 2, c), x.dtype)
    up = up.at[:, :, 0, :, 0, :].set(x)
    up = up.reshape(n, 2 * h, 2 * w, c)
    oh, ow = out_hw
    return jnp.pad(up, ((0, 0), (0, oh - 2 * h), (0, ow - 2 * w), (0, 0)))


# ----------------------------------------------------------------------------
# Parameter preparation (done ONCE, outside the jitted forward):
# fold eval-mode BN, flip transposed-conv kernels, reshape to (K, N), cast bf16.
# ----------------------------------------------------------------------------
def _fold_bn(w, b, bn, out_axis):
    scale = bn['gamma'] / jnp.sqrt(bn['var'] + BN_EPS)
    shp = [1] * w.ndim
    shp[out_axis] = -1
    return w * scale.reshape(shp), (b - bn['mean']) * scale + bn['beta']


def _prep_conv(conv, bn):
    wf, bf = _fold_bn(conv['w'], conv['b'], bn, out_axis=0)   # (Cout, Cin, kh, kw)
    cout, cin, kh, kw = wf.shape
    wm = wf.transpose(2, 3, 1, 0).reshape(kh * kw * cin, cout)  # rows: (dh, dw, cin)
    return {'wm': wm.astype(jnp.bfloat16),
            'b': bf.astype(jnp.float32).reshape(1, cout)}


def _prep_convT(ct, bn):
    # ConvTranspose2d(k, s=1, p=0) == Conv2d with flipped kernel on a (k-1)-padded input.
    w_conv = jnp.flip(ct['w'], axis=(2, 3)).transpose(1, 0, 2, 3)  # (Cout, Cin, kh, kw)
    return _prep_conv({'w': w_conv, 'b': ct['b']}, bn)


def _prep_linear(lin, bn):
    wf, bf = _fold_bn(lin['w'], lin['b'], bn, out_axis=0)      # (out, in)
    return {'wm': wf.T.astype(jnp.bfloat16),
            'b': bf.astype(jnp.float32).reshape(1, -1)}


def prepare_params(raw):
    return {
        'e_cn1': _prep_conv(raw['e_cn1'], raw['e_bn1']),
        'e_cn2': _prep_conv(raw['e_cn2'], raw['e_bn2']),
        'e_cn3': _prep_conv(raw['e_cn3'], raw['e_bn3']),
        'e_cn4': _prep_conv(raw['e_cn4'], raw['e_bn4']),
        'e_l1': _prep_linear(raw['e_l1'], raw['e_bn5']),
        'd_l1': _prep_linear(raw['d_l1'], raw['d_bn5']),
        'd_ct4': _prep_convT(raw['d_ct4'], raw['d_bn4']),
        'd_ct3': _prep_convT(raw['d_ct3'], raw['d_bn3']),
        'd_ct2': _prep_convT(raw['d_ct2'], raw['d_bn2']),
        'd_ct1': _prep_convT(raw['d_ct1'], raw['d_bn1']),
    }


# ----------------------------------------------------------------------------
# AtariConv_v2 forward (eval mode): returns (decoded, mu, logvar=None).
# ----------------------------------------------------------------------------
def atari_conv_v2_forward(x_nchw, P):
    n = x_nchw.shape[0]
    x = x_nchw.transpose(0, 2, 3, 1)                       # NHWC (N, 210, 160, 3)

    # ---- Encoder ----
    e = conv_bn_relu(x, P['e_cn1'], k=5, pad=0)            # (N, 206, 156, 32)
    e = maxpool2x2(e)                                      # (N, 103,  78, 32)
    e = conv_bn_relu(e, P['e_cn2'], k=5, pad=0)            # (N,  99,  74, 32)
    e = maxpool2x2(e)                                      # (N,  49,  37, 32)
    e = conv_bn_relu(e, P['e_cn3'], k=5, pad=0)            # (N,  45,  33, 16)
    e = maxpool2x2(e)                                      # (N,  22,  16, 16)
    e = conv_bn_relu(e, P['e_cn4'], k=5, pad=0)            # (N,  18,  12,  8)
    e = maxpool2x2(e)                                      # (N,   9,   6,  8)
    flat = e.transpose(0, 3, 1, 2).reshape(n, 432)         # PyTorch (c, h, w) flatten
    mu = linear_bn_relu(flat, P['e_l1'])                   # (N, 256)
    logvar = None                                          # Encoder returns (mu, None, indices)
    z = mu                                                 # reparameterize(mu, None) -> mu

    # ---- Decoder (pool indices are overwritten with default unpool indices) ----
    d = linear_bn_relu(z, P['d_l1'])                       # (N, 432)
    d = d.reshape(n, 8, 9, 6).transpose(0, 2, 3, 1)        # NHWC (N, 9, 6, 8)
    d = unpool2x2(d, (18, 12))
    d = conv_bn_relu(d, P['d_ct4'], k=5, pad=4)            # (N, 22, 16, 16)
    d = unpool2x2(d, (45, 33))
    d = conv_bn_relu(d, P['d_ct3'], k=5, pad=4)            # (N, 49, 37, 32)
    d = unpool2x2(d, (99, 74))
    d = conv_bn_relu(d, P['d_ct2'], k=5, pad=4)            # (N, 103, 78, 32)
    d = unpool2x2(d, (206, 156))
    d = conv_bn_relu(d, P['d_ct1'], k=5, pad=4)            # (N, 210, 160, 3)

    decoded = d.transpose(0, 3, 1, 2).reshape(x_nchw.shape)
    return decoded, mu, logvar


# ----------------------------------------------------------------------------
# Deterministic synthetic parameters (BN uses running stats, eval mode).
# ----------------------------------------------------------------------------
def _init_conv(key, cout, cin, k):
    k1, k2 = jax.random.split(key)
    std = jnp.sqrt(2.0 / (cin * k * k))
    return {'w': std * jax.random.normal(k1, (cout, cin, k, k), jnp.float32),
            'b': 0.05 * jax.random.normal(k2, (cout,), jnp.float32)}


def _init_convT(key, cin, cout, k):
    k1, k2 = jax.random.split(key)
    std = jnp.sqrt(2.0 / (cin * k * k))
    return {'w': std * jax.random.normal(k1, (cin, cout, k, k), jnp.float32),
            'b': 0.05 * jax.random.normal(k2, (cout,), jnp.float32)}


def _init_linear(key, nin, nout):
    k1, k2 = jax.random.split(key)
    std = jnp.sqrt(2.0 / nin)
    return {'w': std * jax.random.normal(k1, (nout, nin), jnp.float32),
            'b': 0.05 * jax.random.normal(k2, (nout,), jnp.float32)}


def _init_bn(key, nf):
    k1, k2, k3, k4 = jax.random.split(key, 4)
    return {'gamma': 1.0 + 0.1 * jax.random.normal(k1, (nf,), jnp.float32),
            'beta': 0.1 * jax.random.normal(k2, (nf,), jnp.float32),
            'mean': 0.1 * jax.random.normal(k3, (nf,), jnp.float32),
            'var': 0.5 + jax.random.uniform(k4, (nf,), jnp.float32)}


def init_params(key):
    ks = jax.random.split(key, 20)
    return {
        'e_cn1': _init_conv(ks[0], 32, 3, 5),   'e_bn1': _init_bn(ks[1], 32),
        'e_cn2': _init_conv(ks[2], 32, 32, 5),  'e_bn2': _init_bn(ks[3], 32),
        'e_cn3': _init_conv(ks[4], 16, 32, 5),  'e_bn3': _init_bn(ks[5], 16),
        'e_cn4': _init_conv(ks[6], 8, 16, 5),   'e_bn4': _init_bn(ks[7], 8),
        'e_l1': _init_linear(ks[8], 432, 256),  'e_bn5': _init_bn(ks[9], 256),
        'd_l1': _init_linear(ks[10], 256, 432), 'd_bn5': _init_bn(ks[11], 432),
        'd_ct4': _init_convT(ks[12], 8, 16, 5), 'd_bn4': _init_bn(ks[13], 16),
        'd_ct3': _init_convT(ks[14], 16, 32, 5), 'd_bn3': _init_bn(ks[15], 32),
        'd_ct2': _init_convT(ks[16], 32, 32, 5), 'd_bn2': _init_bn(ks[17], 32),
        'd_ct1': _init_convT(ks[18], 32, 3, 5),  'd_bn1': _init_bn(ks[19], 3),
    }


# ----------------------------------------------------------------------------
if __name__ == "__main__":
    key = jax.random.PRNGKey(0)
    kx, kp, ka, kb, kc = jax.random.split(key, 5)

    # Sanity check of the fused Pallas matmul (unaligned M/K/N, bf16 operands).
    a = jax.random.normal(ka, (37, 91), jnp.float32)
    w = jax.random.normal(kb, (91, 11), jnp.float32)
    bias = jax.random.normal(kc, (11,), jnp.float32)
    got = matmul_bias_relu(a, w, bias.reshape(1, 11))
    ref = jnp.maximum(
        a.astype(jnp.bfloat16).astype(jnp.float32)
        @ w.astype(jnp.bfloat16).astype(jnp.float32) + bias, 0.0)
    assert jnp.allclose(got, ref, atol=1e-2, rtol=1e-2)

    # The module hard-codes its geometry to (210, 160) RGB inputs (Linear(432,...)
    # and the decoder's unpool output sizes), so that is the shape the forward implies.
    x = jax.random.normal(kx, (2, 3, 210, 160), jnp.float32)
    raw_params = init_params(kp)
    prepared = prepare_params(raw_params)   # BN folding / reshapes / bf16 done once

    fwd = jax.jit(atari_conv_v2_forward)
    decoded, mu, logvar = fwd(x, prepared)
    decoded = jax.block_until_ready(decoded)
    mu = jax.block_until_ready(mu)

    assert decoded.shape == x.shape, decoded.shape        # (2, 3, 210, 160)
    assert mu.shape == (2, 256), mu.shape                 # bottleneck
    assert logvar is None
    assert bool(jnp.all(jnp.isfinite(decoded)))
    assert bool(jnp.all(jnp.isfinite(mu)))

    print("KERNEL_OK")
</pallas_src>

<mosaic_0001>
module attributes {stable_mosaic.version = 11 : i64} {
  func.func @_fused_matmul_kernel(%arg0: i32, %arg1: memref<40x91xbf16, #tpu.memory_space<vmem>>, %arg2: memref<91x11xbf16, #tpu.memory_space<vmem>>, %arg3: memref<1x11xf32, #tpu.memory_space<vmem>>, %arg4: memref<40x11xf32, #tpu.memory_space<vmem>>) attributes {dimension_semantics = [#tpu.dimension_semantics<parallel>], iteration_bounds = array<i64: 1>, scalar_prefetch = 0 : i64, scratch_operands = 0 : i64, tpu.core_type = #tpu.core_type<tc>, window_params = [{transform_indices = @transform_0, window_bounds = array<i64: 40, 91>}, {pipeline_mode = #tpu.pipeline_mode<synchronous>, transform_indices = @transform_1, window_bounds = array<i64: 91, 11>}, {pipeline_mode = #tpu.pipeline_mode<synchronous>, transform_indices = @transform_2, window_bounds = array<i64: 1, 11>}, {transform_indices = @transform_3, window_bounds = array<i64: 40, 11>}]} {
    %c0 = arith.constant 0 : index
    %c0_0 = arith.constant 0 : index
    %0 = vector.load %arg1[%c0, %c0_0] : memref<40x91xbf16, #tpu.memory_space<vmem>>, vector<40x91xbf16>
    %c0_1 = arith.constant 0 : index
    %c0_2 = arith.constant 0 : index
    %1 = vector.load %arg2[%c0_1, %c0_2] : memref<91x11xbf16, #tpu.memory_space<vmem>>, vector<91x11xbf16>
    %cst = arith.constant dense<0.000000e+00> : vector<40x11xf32>
    %2 = tpu.matmul %0, %1, %cst {dimension_numbers = #tpu.dot_dimension_numbers<[1], [0], [0], [1], [0, 0, 1, 1], [], []>} : vector<40x91xbf16>, vector<91x11xbf16>, vector<40x11xf32> -> vector<40x11xf32>
    %c0_3 = arith.constant 0 : index
    %c0_4 = arith.constant 0 : index
    %3 = vector.load %arg3[%c0_3, %c0_4] : memref<1x11xf32, #tpu.memory_space<vmem>>, vector<1x11xf32>
    %4 = vector.broadcast %3 : vector<1x11xf32> to vector<40x11xf32>
    %5 = arith.addf %2, %4 : vector<40x11xf32>
    %cst_5 = arith.constant 0.000000e+00 : f32
    %6 = vector.broadcast %cst_5 : f32 to vector<40x11xf32>
    %7 = arith.maximumf %5, %6 : vector<40x11xf32>
    %c0_6 = arith.constant 0 : index
    %c0_7 = arith.constant 0 : index
    %8 = vector.load %arg4[%c0_6, %c0_7] : memref<40x11xf32, #tpu.memory_space<vmem>>, vector<40x11xf32>
    tpu.vector_store %arg4[%c0_6, %c0_7], %7 {strides = array<i32>} : memref<40x11xf32, #tpu.memory_space<vmem>>, vector<40x11xf32>,
    return
  }
  func.func @transform_0(%arg0: i32) -> (i32, i32) {
    %c0_i32 = arith.constant 0 : i32
    %c0_i32_0 = arith.constant 0 : i32
    return %arg0, %c0_i32 : i32, i32
  }
  func.func @transform_1(%arg0: i32) -> (i32, i32) {
    %c0_i32 = arith.constant 0 : i32
    %c0_i32_0 = arith.constant 0 : i32
    %c0_i32_1 = arith.constant 0 : i32
    return %c0_i32, %c0_i32_0 : i32, i32
  }
  func.func @transform_2(%arg0: i32) -> (i32, i32) {
    %c0_i32 = arith.constant 0 : i32
    %c0_i32_0 = arith.constant 0 : i32
    %c0_i32_1 = arith.constant 0 : i32
    return %c0_i32, %c0_i32_0 : i32, i32
  }
  func.func @transform_3(%arg0: i32) -> (i32, i32) {
    %c0_i32 = arith.constant 0 : i32
    %c0_i32_0 = arith.constant 0 : i32
    return %arg0, %c0_i32 : i32, i32
  }
}

</mosaic_0001>

<bundles_post_ra>
// kernel: tpu_custom_call.1
= control target key start
LH: loop header
LB: loop body
LE: loop exit
PB: predicated region body
PF: predicated region fallthrough
CT: control target
= control target key end

     0   :  { %v245_v0 = vmov 0.0   ;;  %vm246_vm0 = vmmov 0   ;;  %vm97_vm1 = vcmask 1044480   ;;  %vm98_vm2 = vcmask 1045504   ;;  %s321_s1 = inlined_call_operand.vmem [shape: bf16[91,11], index: 1, kind: input, shape index: {}]   ;;  %s322_s0 = inlined_call_operand.vmem [shape: bf16[40,91], index: 0, kind: input, shape index: {}]   ;;  %s323_s2 = inlined_call_operand.vmem [shape: f32[1,11], index: 2, kind: input, shape index: {}]   ;;  %s324_s3 = inlined_call_operand.vmem [shape: f32[40,11], index: 3, kind: output, shape index: {}]  }
   0x1   :  { %221 = vmatprep.subr.bf16.mxu1 %v245_v0  ;;  %v236_v1 = vld [vmem:[%s321_s1] sm:$0xff]   ;;  %197 = vmatprep.subr.bf16.mxu0 %v245_v0  ;;  %v237_v2 = vld [vmem:[%s321_s1 + $0x8] sm:$0xff]   ;;  %v238_v3 = vld [vmem:[%s321_s1 + $0x10] sm:$0xff]   ;;  %v247_v5 = vmov 65535   ;;  %vm87_vm3 = vcmask 744448   ;;  %vm165_vm4 = vcmask 89088  }
   0x2   :  { %227 = vmatpush3.bf16.msra.mxu1 %v236_v1  ;;  %198 = vmatpush3.bf16.msra.mxu0 %v236_v1  ;;  %v239_v4 = vld [vmem:[%s321_s1 + $0x18] sm:$0xff]   ;;  %v99_v6 = vsel %vm97_vm1, 4294967295, %v247_v5  ;;  %v240_v7 = vld [vmem:[%s321_s1 + $0x20] sm:$0xff]   ;;  %v241_v8 = vld [vmem:[%s321_s1 + $0x28] sm:$0x3f]  }
   0x3   :  { %222 = vmatprep.subr.bf16.mxu1 %v245_v0  ;;  %199 = vmatprep.subr.bf16.mxu0 %v245_v0  ;;  %v100_v9 = vsel %vm98_vm2, %v99_v6, 0  ;;  %v242_v11 = vld [vmem:[%s322_s0 + $0x8] sm:$0xff]   ;;  %v243_v12 = vld [vmem:[%s322_s0] sm:$0xff]   ;;  %v244_v13 = vld [vmem:[%s322_s0 + $0x10] ss:$0 sps:$4 sm:$0xff]  }
   0x4   :  { %213 = vmatprep.mubr.msk.bf16.mxu1 %vm246_vm0, %v245_v0  ;;  %209 = vmatprep.mubr.msk.bf16.mxu0 %vm246_vm0, %v245_v0  ;;  %v102_v10 = vand.u32 %v241_v8, %v100_v9  ;;  %v175_v14 = vld [vmem:[%s323_s2] ss:$0 sm:$0xff] }
   0x6   :  { %228 = vmatpush3.bf16.msra.mxu1 %v237_v2  ;;  %200 = vmatpush3.bf16.msra.mxu0 %v237_v2 }
   0x7   :  { %223 = vmatprep.subr.bf16.mxu1 %v245_v0  ;;  %201 = vmatprep.subr.bf16.mxu0 %v245_v0 }
   0xa   :  { %229 = vmatpush3.bf16.msra.mxu1 %v238_v3  ;;  %202 = vmatpush3.bf16.msra.mxu0 %v238_v3 }
   0xb   :  { %224 = vmatprep.subr.bf16.mxu1 %v245_v0  ;;  %203 = vmatprep.subr.bf16.mxu0 %v245_v0 }
   0xe   :  { %230 = vmatpush3.bf16.msra.mxu1 %v239_v4  ;;  %204 = vmatpush3.bf16.msra.mxu0 %v239_v4 }
   0xf   :  { %225 = vmatprep.subr.bf16.mxu1 %v245_v0  ;;  %205 = vmatprep.subr.bf16.mxu0 %v245_v0 }
  0x12   :  { %231 = vmatpush3.bf16.msra.mxu1 %v240_v7  ;;  %206 = vmatpush3.bf16.msra.mxu0 %v240_v7 }
  0x13   :  { %226 = vmatprep.subr.bf16.mxu1 %v245_v0  ;;  %207 = vmatprep.subr.bf16.mxu0 %v245_v0 }
  0x16   :  { %232 = vmatpush3.bf16.msra.mxu1 %v102_v10  ;;  %208 = vmatpush3.bf16.msra.mxu0 %v102_v10 }
  0x19   :  { %214 = vmatmul.mubr.msk.bf16.vlgmr.msra.gmra.mrb[0].mxu1 %vm87_vm3, %v242_v11  ;;  %210 = vmatmul.mubr.msk.bf16.vlgmr.msra.gmra.mrb[0].mxu0 %vm87_vm3, %v243_v12 }
  0x1a   :  { %217 = vmatprep.mubr.msk.bf16.mxu1 %vm246_vm0, %v245_v0 }
  0x21   :  { %218 = vmatmul.mubr.msk.bf16.gmra.mrb[4].mxu1 %vm87_vm3, %v244_v13 }
  0xec   :  { %v146_v15 = vpop.f32.mrb[0].mxu1  ;;  %v138_v16 = vpop.f32.mrb[0].mxu0 }
  0xed   :  { %v147_v17 = vadd.f32 %v175_v14, %v146_v15  ;;  %v215_v18 = vpop.f32.mrb[1].mxu1  ;;  %v139_v19 = vadd.f32 %v175_v14, %v138_v16  ;;  %v211_v20 = vpop.f32.mrb[1].mxu0 }
  0xee   :  { %v149_v21 = vpop.f32.mrb[2].mxu1  ;;  %v141_v22 = vpop.f32.mrb[2].mxu0 }
  0xef   :  { %v162_v23 = vmax.f32 %v147_v17, 0.0  ;;  %v150_v24 = vadd.f32 %v175_v14, %v149_v21  ;;  %v160_v25 = vmax.f32 %v139_v19, 0.0  ;;  %v216_v26 = vpop.f32.mrb[3].mxu1  ;;  %v142_v27 = vadd.f32 %v175_v14, %v141_v22  ;;  %v212_v28 = vpop.f32.mrb[3].mxu0 }
  0xf1   :  { %168 = vst.msk [vmem:[%s324_s3 + $0x10] sm:$0xff] %vm165_vm4, %v162_v23  ;;  %v163_v29 = vmax.f32 %v150_v24, 0.0  ;;  %166 = vst.msk [vmem:[%s324_s3] sm:$0xff] %vm165_vm4, %v160_v25  ;;  %v161_v30 = vmax.f32 %v142_v27, 0.0 }
  0xf3   :  { %169 = vst.msk [vmem:[%s324_s3 + $0x18] sm:$0xff] %vm165_vm4, %v163_v29  ;;  %167 = vst.msk [vmem:[%s324_s3 + $0x8] sm:$0xff] %vm165_vm4, %v161_v30 }
  0xf4   :  { %v154_v31 = vpop.f32.mrb[4].mxu1 }
  0xf5   :  { %v155_v32 = vadd.f32 %v175_v14, %v154_v31  ;;  %v219_v33 = vpop.f32.mrb[5].mxu1 }
  0xf6   :  { %v157_v34 = vpop.f32.mrb[6].mxu1 }
  0xf7   :  { %v164_v35 = vmax.f32 %v155_v32, 0.0  ;;  %v220_v36 = vpop.f32.mrb[7].mxu1 }
  0xf9   :  { %170 = vst.msk [vmem:[%s324_s3 + $0x20] sm:$0xff] %vm165_vm4, %v164_v35 }

</bundles_post_ra>
